<compile_context>
chip_gen: v5e
topology: v5e:2x2
jax: 0.10.0
libtpu: 0.0.40
codegen_flags: <defaults>
</compile_context>

<pallas_src>
import functools

import jax
import jax.numpy as jnp
from jax.experimental import pallas as pl
from jax.experimental.pallas import tpu as pltpu

_P = 128           # lane width / padded feature dim for every layer
_NUM_LAYERS = 4    # fc1, fc2, fc3, out
_BIAS_ROWS = 8     # bias rows appended to the weight slab (rows 0..3 used)
_SLAB_ROWS = _NUM_LAYERS * _P + _BIAS_ROWS   # 520


def _mlp_softmax_kernel(feat_in, feat_out, x_ref, w_ref, o_ref):
    """One batch tile: fused 4-layer MLP + stable softmax.

    x_ref: (tb, feat_in) f32   input tile at natural width
    w_ref: (520, 128)    bf16  rows 0..511 = 4 stacked 128x128 weight blocks,
                               rows 512..515 = biases (zero-padded lanes)
    o_ref: (tb, 128)     bf16  softmax output (padded lanes = 0)
    """
    h = x_ref[...].astype(jnp.bfloat16)

    # All 4 bias rows in one aligned (8, 128) load, promoted to f32.
    biases = w_ref[_NUM_LAYERS * _P:_NUM_LAYERS * _P + _BIAS_ROWS, :].astype(
        jnp.float32)

    # Layer 1: contract only over the real K = feat_in rows.
    z = jnp.dot(h, w_ref[0:feat_in, :], preferred_element_type=jnp.float32)
    z = z + biases[0:1, :]
    h = jnp.maximum(z, 0.0).astype(jnp.bfloat16)

    # Hidden layers 2..3: full 128x128 blocks.
    for li in range(1, _NUM_LAYERS - 1):
        z = jnp.dot(h, w_ref[li * _P:(li + 1) * _P, :],
                    preferred_element_type=jnp.float32)
        z = z + biases[li:li + 1, :]
        h = jnp.maximum(z, 0.0).astype(jnp.bfloat16)

    # Output layer.
    logits = jnp.dot(h, w_ref[(_NUM_LAYERS - 1) * _P:_NUM_LAYERS * _P, :],
                     preferred_element_type=jnp.float32)
    logits = logits + biases[_NUM_LAYERS - 1:_NUM_LAYERS, :]

    # Mask padded lanes explicitly so they never perturb the softmax.
    lane = jax.lax.broadcasted_iota(jnp.int32, logits.shape, 1)
    logits = jnp.where(lane < feat_out, logits, jnp.float32(-1e30))

    m = jnp.max(logits, axis=-1, keepdims=True)
    e = jnp.exp(logits - m)
    denom = jnp.sum(e, axis=-1, keepdims=True)
    o_ref[...] = (e / denom).astype(o_ref.dtype)   # exact division (f32)


def _pack_params(params):
    """Pack 4 (w, b) pairs into a single (520, 128) bf16 slab."""
    slab = jnp.zeros((_SLAB_ROWS, _P), jnp.float32)
    for i in range(1, _NUM_LAYERS + 1):
        w = params[f"w{i}"]                    # (fan_in, fan_out) f32
        b = params[f"b{i}"].reshape(-1)        # (fan_out,) f32
        fi, fo = w.shape
        assert fi <= _P and fo <= _P, "layer dims must fit one 128-lane block"
        slab = slab.at[(i - 1) * _P:(i - 1) * _P + fi, :fo].set(w)
        slab = slab.at[_NUM_LAYERS * _P + (i - 1), :fo].set(b)
    return slab.astype(jnp.bfloat16)


def _round_up(v, m):
    return ((v + m - 1) // m) * m


def net_forward(x, params, *, block_batch=2048):
    """x: [batch, feat_in] float32. params: dict w1..w4 (in,out), b1..b4."""
    batch, feat_in = x.shape
    feat_out = params["w4"].shape[1]
    assert feat_in == params["w1"].shape[0]
    assert feat_in <= _P and feat_out <= _P
    # TODO(synk): feat_in / feat_out > 128 would need K/N tiling of the matmuls.

    w_slab = _pack_params(params)

    # Batch tile: multiple of 16 (bf16 sublane packing), capped by block_batch,
    # and clamped so batches > block_batch*? produce >= 2 grid steps so both
    # v7x TensorCores get work under dimension_semantics=("parallel",).
    half = _round_up((batch + 1) // 2, 16)
    tb = max(16, min(block_batch, half))
    num_tiles = pl.cdiv(batch, tb)
    padded_batch = num_tiles * tb

    # Only the (small) batch remainder gets padded; x stays at natural width.
    xp = x if padded_batch == batch else jnp.pad(
        x, ((0, padded_batch - batch), (0, 0)))

    kernel = functools.partial(_mlp_softmax_kernel, feat_in, feat_out)

    cost = pl.CostEstimate(
        flops=2 * padded_batch * (feat_in * _P + (_NUM_LAYERS - 1) * _P * _P),
        transcendentals=padded_batch * _P,
        bytes_accessed=(padded_batch * feat_in * 4      # x (f32, natural width)
                        + _SLAB_ROWS * _P * 2           # weight+bias slab (bf16)
                        + padded_batch * _P * 2),       # output (bf16)
    )

    out = pl.pallas_call(
        kernel,
        out_shape=jax.ShapeDtypeStruct((padded_batch, _P), jnp.bfloat16),
        grid=(num_tiles,),
        in_specs=[
            pl.BlockSpec((tb, feat_in), lambda i: (i, 0)),      # x tile
            pl.BlockSpec((_SLAB_ROWS, _P), lambda i: (0, 0)),   # resident slab
        ],
        out_specs=pl.BlockSpec((tb, _P), lambda i: (i, 0)),
        compiler_params=pltpu.CompilerParams(
            dimension_semantics=("parallel",)),
        cost_estimate=cost,
    )(xp, w_slab)

    return out[:batch, :feat_out]


def init_params(key, feat_num_in, feat_num_out):
    """Deterministic init mimicking PyTorch Linear default: U(-1/sqrt(fan_in), +)."""
    dims = [(feat_num_in, 10), (10, 50), (50, 100), (100, feat_num_out)]
    params = {}
    for i, (fan_in, fan_out) in enumerate(dims, start=1):
        key, kw, kb = jax.random.split(key, 3)
        bound = 1.0 / (fan_in ** 0.5)
        params[f"w{i}"] = jax.random.uniform(
            kw, (fan_in, fan_out), jnp.float32, minval=-bound, maxval=bound)
        params[f"b{i}"] = jax.random.uniform(
            kb, (1, fan_out), jnp.float32, minval=-bound, maxval=bound)
    return params


if __name__ == "__main__":
    key = jax.random.PRNGKey(0)
    feat_num_in, feat_num_out = 16, 4
    batch = 8

    kparams, kx = jax.random.split(key)
    params = init_params(kparams, feat_num_in, feat_num_out)
    x = jax.random.normal(kx, (batch, feat_num_in), dtype=jnp.float32)

    out = jax.block_until_ready(net_forward(x, params))
    out_f32 = out.astype(jnp.float32)

    # Reference that matches the kernel's numerics (bf16 weights/biases,
    # f32 accumulation, f32 softmax).
    def ref_bf16(x, p):
        h = x.astype(jnp.bfloat16)
        for i in range(1, _NUM_LAYERS):
            w = p[f"w{i}"].astype(jnp.bfloat16)
            b = p[f"b{i}"].astype(jnp.bfloat16).astype(jnp.float32)
            z = jnp.dot(h, w, preferred_element_type=jnp.float32) + b
            h = jnp.maximum(z, 0.0).astype(jnp.bfloat16)
        w4 = p["w4"].astype(jnp.bfloat16)
        b4 = p["b4"].astype(jnp.bfloat16).astype(jnp.float32)
        logits = jnp.dot(h, w4, preferred_element_type=jnp.float32) + b4
        return jax.nn.softmax(logits, axis=-1)

    # Full-precision reference (original PyTorch semantics) for a sanity check.
    def ref_f32(x, p):
        h = jnp.maximum(x @ p["w1"] + p["b1"], 0.0)
        h = jnp.maximum(h @ p["w2"] + p["b2"], 0.0)
        h = jnp.maximum(h @ p["w3"] + p["b3"], 0.0)
        return jax.nn.softmax(h @ p["w4"] + p["b4"], axis=-1)

    expected = ref_bf16(x, params)
    expected_f32 = ref_f32(x, params)

    assert out.shape == (batch, feat_num_out)
    assert out.dtype == jnp.bfloat16
    # bf16 output quantization (~1/256 relative) + bf16 matmul path.
    assert jnp.allclose(out_f32, expected, atol=2e-2, rtol=2e-2)
    assert jnp.allclose(out_f32, expected_f32, atol=5e-2, rtol=5e-2)
    # Rows sum to 1 up to bf16 output rounding (denominator is exact in f32).
    assert jnp.allclose(out_f32.sum(axis=-1), 1.0, atol=2e-2)

    print("KERNEL_OK")
</pallas_src>

<mosaic_0001>
module attributes {stable_mosaic.version = 11 : i64} {
  func.func @_mlp_softmax_kernel(%arg0: i32, %arg1: memref<16x16xf32, #tpu.memory_space<vmem>>, %arg2: memref<520x128xbf16, #tpu.memory_space<vmem>>, %arg3: memref<16x128xbf16, #tpu.memory_space<vmem>>) attributes {dimension_semantics = [#tpu.dimension_semantics<parallel>], iteration_bounds = array<i64: 1>, scalar_prefetch = 0 : i64, scratch_operands = 0 : i64, tpu.core_type = #tpu.core_type<tc>, window_params = [{transform_indices = @transform_0, window_bounds = array<i64: 16, 16>}, {pipeline_mode = #tpu.pipeline_mode<synchronous>, transform_indices = @transform_1, window_bounds = array<i64: 520, 128>}, {transform_indices = @transform_2, window_bounds = array<i64: 16, 128>}]} {
    %c0 = arith.constant 0 : index
    %c0_0 = arith.constant 0 : index
    %0 = vector.load %arg1[%c0, %c0_0] : memref<16x16xf32, #tpu.memory_space<vmem>>, vector<16x16xf32>
    %1 = arith.truncf %0 : vector<16x16xf32> to vector<16x16xbf16>
    %c512 = arith.constant 512 : index
    %c0_1 = arith.constant 0 : index
    %2 = vector.load %arg2[%c512, %c0_1] : memref<520x128xbf16, #tpu.memory_space<vmem>>, vector<8x128xbf16>
    %3 = arith.extf %2 : vector<8x128xbf16> to vector<8x128xf32>
    %c0_2 = arith.constant 0 : index
    %c0_3 = arith.constant 0 : index
    %4 = vector.load %arg2[%c0_2, %c0_3] : memref<520x128xbf16, #tpu.memory_space<vmem>>, vector<16x128xbf16>
    %cst = arith.constant dense<0.000000e+00> : vector<16x128xf32>
    %5 = tpu.matmul %1, %4, %cst {dimension_numbers = #tpu.dot_dimension_numbers<[1], [0], [0], [1], [0, 0, 1, 1], [], []>} : vector<16x16xbf16>, vector<16x128xbf16>, vector<16x128xf32> -> vector<16x128xf32>
    %6 = vector.extract_strided_slice %3 {offsets = [0, 0], sizes = [1, 128], strides = [1, 1]} : vector<8x128xf32> to vector<1x128xf32>
    %7 = vector.broadcast %6 : vector<1x128xf32> to vector<16x128xf32>
    %8 = arith.addf %5, %7 : vector<16x128xf32>
    %cst_4 = arith.constant 0.000000e+00 : f32
    %9 = vector.broadcast %cst_4 : f32 to vector<16x128xf32>
    %10 = arith.maximumf %8, %9 : vector<16x128xf32>
    %11 = arith.truncf %10 : vector<16x128xf32> to vector<16x128xbf16>
    %c128 = arith.constant 128 : index
    %c0_5 = arith.constant 0 : index
    %12 = vector.load %arg2[%c128, %c0_5] : memref<520x128xbf16, #tpu.memory_space<vmem>>, vector<128x128xbf16>
    %cst_6 = arith.constant dense<0.000000e+00> : vector<16x128xf32>
    %13 = tpu.matmul %11, %12, %cst_6 {dimension_numbers = #tpu.dot_dimension_numbers<[1], [0], [0], [1], [0, 0, 1, 1], [], []>} : vector<16x128xbf16>, vector<128x128xbf16>, vector<16x128xf32> -> vector<16x128xf32>
    %14 = vector.extract_strided_slice %3 {offsets = [1, 0], sizes = [1, 128], strides = [1, 1]} : vector<8x128xf32> to vector<1x128xf32>
    %15 = vector.broadcast %14 : vector<1x128xf32> to vector<16x128xf32>
    %16 = arith.addf %13, %15 : vector<16x128xf32>
    %cst_7 = arith.constant 0.000000e+00 : f32
    %17 = vector.broadcast %cst_7 : f32 to vector<16x128xf32>
    %18 = arith.maximumf %16, %17 : vector<16x128xf32>
    %19 = arith.truncf %18 : vector<16x128xf32> to vector<16x128xbf16>
    %c256 = arith.constant 256 : index
    %c0_8 = arith.constant 0 : index
    %20 = vector.load %arg2[%c256, %c0_8] : memref<520x128xbf16, #tpu.memory_space<vmem>>, vector<128x128xbf16>
    %cst_9 = arith.constant dense<0.000000e+00> : vector<16x128xf32>
    %21 = tpu.matmul %19, %20, %cst_9 {dimension_numbers = #tpu.dot_dimension_numbers<[1], [0], [0], [1], [0, 0, 1, 1], [], []>} : vector<16x128xbf16>, vector<128x128xbf16>, vector<16x128xf32> -> vector<16x128xf32>
    %22 = vector.extract_strided_slice %3 {offsets = [2, 0], sizes = [1, 128], strides = [1, 1]} : vector<8x128xf32> to vector<1x128xf32>
    %23 = vector.broadcast %22 : vector<1x128xf32> to vector<16x128xf32>
    %24 = arith.addf %21, %23 : vector<16x128xf32>
    %cst_10 = arith.constant 0.000000e+00 : f32
    %25 = vector.broadcast %cst_10 : f32 to vector<16x128xf32>
    %26 = arith.maximumf %24, %25 : vector<16x128xf32>
    %27 = arith.truncf %26 : vector<16x128xf32> to vector<16x128xbf16>
    %c384 = arith.constant 384 : index
    %c0_11 = arith.constant 0 : index
    %28 = vector.load %arg2[%c384, %c0_11] : memref<520x128xbf16, #tpu.memory_space<vmem>>, vector<128x128xbf16>
    %cst_12 = arith.constant dense<0.000000e+00> : vector<16x128xf32>
    %29 = tpu.matmul %27, %28, %cst_12 {dimension_numbers = #tpu.dot_dimension_numbers<[1], [0], [0], [1], [0, 0, 1, 1], [], []>} : vector<16x128xbf16>, vector<128x128xbf16>, vector<16x128xf32> -> vector<16x128xf32>
    %30 = vector.extract_strided_slice %3 {offsets = [3, 0], sizes = [1, 128], strides = [1, 1]} : vector<8x128xf32> to vector<1x128xf32>
    %31 = vector.broadcast %30 : vector<1x128xf32> to vector<16x128xf32>
    %32 = arith.addf %29, %31 : vector<16x128xf32>
    %33 = tpu.iota {dimensions = array<i32: 1>} : vector<16x128xi32>
    %c4_i32 = arith.constant 4 : i32
    %34 = vector.broadcast %c4_i32 : i32 to vector<16x128xi32>
    %35 = arith.cmpi slt, %33, %34 : vector<16x128xi32>
    %cst_13 = arith.constant -1.000000e+30 : f32
    %36 = vector.broadcast %cst_13 : f32 to vector<16x128xf32>
    %37 = arith.select %35, %32, %36 : vector<16x128xi1>, vector<16x128xf32>
    %cst_14 = arith.constant dense<0xFF800000> : vector<16xf32>
    %38 = vector.multi_reduction <maximumf>, %37, %cst_14 [1] : vector<16x128xf32> to vector<16xf32>
    %39 = vector.shape_cast %38 : vector<16xf32> to vector<16x1xf32>
    %40 = vector.broadcast %39 : vector<16x1xf32> to vector<16x128xf32>
    %41 = arith.subf %37, %40 : vector<16x128xf32>
    %42 = math.exp %41 : vector<16x128xf32>
    %cst_15 = arith.constant dense<0.000000e+00> : vector<16xf32>
    %43 = vector.multi_reduction <add>, %42, %cst_15 [1] : vector<16x128xf32> to vector<16xf32>
    %44 = vector.shape_cast %43 : vector<16xf32> to vector<16x1xf32>
    %45 = vector.broadcast %44 : vector<16x1xf32> to vector<16x128xf32>
    %46 = arith.divf %42, %45 : vector<16x128xf32>
    %47 = arith.truncf %46 : vector<16x128xf32> to vector<16x128xbf16>
    %c0_16 = arith.constant 0 : index
    %c0_17 = arith.constant 0 : index
    %48 = vector.load %arg3[%c0_16, %c0_17] : memref<16x128xbf16, #tpu.memory_space<vmem>>, vector<16x128xbf16>
    tpu.vector_store %arg3[%c0_16, %c0_17], %47 {strides = array<i32>} : memref<16x128xbf16, #tpu.memory_space<vmem>>, vector<16x128xbf16>,
    return
  }
  func.func @transform_0(%arg0: i32) -> (i32, i32) {
    %c0_i32 = arith.constant 0 : i32
    %c0_i32_0 = arith.constant 0 : i32
    return %arg0, %c0_i32 : i32, i32
  }
  func.func @transform_1(%arg0: i32) -> (i32, i32) {
    %c0_i32 = arith.constant 0 : i32
    %c0_i32_0 = arith.constant 0 : i32
    %c0_i32_1 = arith.constant 0 : i32
    return %c0_i32, %c0_i32_0 : i32, i32
  }
  func.func @transform_2(%arg0: i32) -> (i32, i32) {
    %c0_i32 = arith.constant 0 : i32
    %c0_i32_0 = arith.constant 0 : i32
    return %arg0, %c0_i32 : i32, i32
  }
}

</mosaic_0001>

<bundles_post_ra>
// kernel: tpu_custom_call.1
= control target key start
LH: loop header
LB: loop body
LE: loop exit
PB: predicated region body
PF: predicated region fallthrough
CT: control target
= control target key end

     0   :  { %7 = vsyncpa [#allocation3], 0  ;;  %s657_s0 = inlined_call_operand.hbm [shape: f32[16,16], index: 0, kind: input, shape index: {}]   ;;  %s658_s1 = inlined_call_operand.hbm [shape: bf16[520,128], index: 1, kind: input, shape index: {}]   ;;  %s659_s2 = inlined_call_operand.hbm [shape: bf16[16,128], index: 2, kind: output, shape index: {}]  }
   0x1   :  { %8 = vsyncpa [#allocation6], 0 }
   0x2   :  { %9 = vsyncpa [#allocation4], 0  ;;  %s14_s11 = sshll.u32 %s657_s0, 4  ;;  %s620_s12 = smov [#allocation2]   ;;  %s15_s11 = int_to_ptr.hbm [resolvable:$true] %s14_s11 }
   0x3   :  { %s16_s13 = sshll.u32 %s620_s12, 4  ;;  %s27_s16 = sshll.u32 %s658_s1, 4  ;;  %s17_s13 = int_to_ptr.vmem [resolvable:$true] %s16_s13  ;;  %s28_s16 = int_to_ptr.hbm [resolvable:$true] %s27_s16 }
   0x4   :  { %s621_s17 = smov 128   ;;  %s622_s18 = smov 8  }
   0x5   :  { %22 = dma.hbm_to_vmem [thread:$0]  %s15_s11, 256, %s17_s13, [#allocation3], %s621_s17, %s621_s17, %s622_s18  }
   0x6   :  { %s623_s19 = smov [#allocation5]   ;;  %s624_s21 = smov 64  }
   0x7   :  { %s29_s20 = sshll.u32 %s623_s19, 4  ;;  %s625_s22 = smov 4   ;;  %s30_s20 = int_to_ptr.vmem [resolvable:$true] %s29_s20 }
   0x8   :  { %35 = dma.hbm_to_vmem [thread:$0]  %s28_s16, 4160, %s30_s20, [#allocation6], %s624_s21, %s624_s21, %s625_s22  }
   0x9   :  { %614 = dma.done.wait [#allocation3], 256  }
   0xa   :  { %615 = vsyncadd [#allocation3], 4294967040 }
   0xb   :  { %616 = dma.done.wait [#allocation6], 4160  }
   0xc   :  { %617 = vsyncadd [#allocation6], 4294963136  ;;  %v497_v0 = vld [vmem:[#allocation5] sm:$0xff]  ;;  %v45_v1 = vld [vmem:[#allocation2] sm:$0xff]  ;;  %vm59_vm0 = vcmask 130048   ;;  %v323_v54 = vlaneseq  ;;  %s626_s0 = smov [#allocation7]  }
   0xd   :  { %v46_v2 = vld [vmem:[#allocation2 + $0x8] sm:$0xff]  ;;  %70 = vmatpush.bf16.msra.mxu0 %v497_v0  ;;  %v504_v5 = vld [vmem:[#allocation5 + $0x70] sm:$0xff]  ;;  %v503_v6 = vld [vmem:[#allocation5 + $0x68] sm:$0xff]  ;;  %s380_s1 = sshll.u32 %s626_s0, 4  ;;  %s382_s25 = sshll.u32 %s659_s2, 4  ;;  %s381_s1 = int_to_ptr.vmem [resolvable:$true] %s380_s1  ;;  %s383_s25 = int_to_ptr.hbm [resolvable:$true] %s382_s25 }
   0xe   :  { %v47_v3 = vpack.c.bf16 %v46_v2, %v45_v1  ;;  %v505_v4 = vld [vmem:[#allocation5 + $0x78] sm:$0xff]  ;;  %v502_v7 = vld [vmem:[#allocation5 + $0x60] sm:$0xff]  ;;  %v500_v9 = vld [vmem:[#allocation5 + $0x50] sm:$0xff]  ;;  %v324_v55 = vand.u32 127, %v323_v54 }
   0xf   :  { %145 = vmatpush.bf16.msra.mxu1 %v505_v4  ;;  %v501_v8 = vld [vmem:[#allocation5 + $0x58] sm:$0xff]  ;;  %v499_v10 = vld [vmem:[#allocation5 + $0x48] sm:$0xff]  ;;  %v498_v11 = vld [vmem:[#allocation5 + $0x40] sm:$0xff] }
  0x10   :  { %400 = vmatmul.msk.bf16.vlgmr.msra.gmra.mxu0 %vm59_vm0, %v47_v3  ;;  %v513_v12 = vld [vmem:[#allocation5 + $0xb8] sm:$0xff]  ;;  %v512_v13 = vld [vmem:[#allocation5 + $0xb0] sm:$0xff]  ;;  %v511_v14 = vld [vmem:[#allocation5 + $0xa8] sm:$0xff]  ;;  %vm325_vm1 = vcmp.lt.s32.totalorder %v324_v55, 4 }
  0x11   :  { %227 = vmatpush.bf16.msra.mxu2 %v513_v12  ;;  %v510_v15 = vld [vmem:[#allocation5 + $0xa0] sm:$0xff]  ;;  %v509_v26 = vld [vmem:[#allocation5 + $0x98] sm:$0xff]  ;;  %v508_v27 = vld [vmem:[#allocation5 + $0x90] sm:$0xff] }
  0x12   :  { %v48_v16 = vld [vmem:[#allocation5 + $0x100] sm:$0xf]  ;;  %v507_v28 = vld [vmem:[#allocation5 + $0x88] sm:$0xff]  ;;  %v521_v30 = vld [vmem:[#allocation5 + $0xf8] sm:$0xff] }
  0x13   :  { %146 = vmatpush.bf16.msra.mxu1 %v504_v5  ;;  %v49_v17 = vunpack.c.l.bf16 %v48_v16  ;;  %v506_v29 = vld [vmem:[#allocation5 + $0x80] sm:$0xff]  ;;  %309 = vmatpush.bf16.msra.mxu3 %v521_v30  ;;  %v520_v31 = vld [vmem:[#allocation5 + $0xf0] sm:$0xff]  ;;  %v519_v32 = vld [vmem:[#allocation5 + $0xe8] sm:$0xff] }
  0x14   :  { %v518_v33 = vld [vmem:[#allocation5 + $0xe0] sm:$0xff]  ;;  %v517_v42 = vld [vmem:[#allocation5 + $0xd8] sm:$0xff]  ;;  %v516_v43 = vld [vmem:[#allocation5 + $0xd0] sm:$0xff] }
  0x15   :  { %228 = vmatpush.bf16.msra.mxu2 %v512_v13  ;;  %v52_v19 = vperm.slane %v49_v17, 0  ;;  %v96_v35 = vperm.slane %v49_v17, 1  ;;  %v515_v44 = vld [vmem:[#allocation5 + $0xc8] sm:$0xff]  ;;  %v514_v45 = vld [vmem:[#allocation5 + $0xc0] sm:$0xff]  ;;  %v178_v47 = vperm.slane %v49_v17, 2  ;;  %v260_v56 = vperm.slane %v49_v17, 3 }
  0x17   :  { %147 = vmatpush.bf16.msra.mxu1 %v503_v6  ;;  %310 = vmatpush.bf16.msra.mxu3 %v520_v31 }
  0x19   :  { %229 = vmatpush.bf16.msra.mxu2 %v511_v14 }
  0x1b   :  { %148 = vmatpush.bf16.msra.mxu1 %v502_v7  ;;  %311 = vmatpush.bf16.msra.mxu3 %v519_v32 }
  0x1d   :  { %230 = vmatpush.bf16.msra.mxu2 %v510_v15 }
  0x1f   :  { %149 = vmatpush.bf16.msra.mxu1 %v501_v8  ;;  %312 = vmatpush.bf16.msra.mxu3 %v518_v33 }
  0x21   :  { %231 = vmatpush.bf16.msra.mxu2 %v509_v26 }
  0x23   :  { %150 = vmatpush.bf16.msra.mxu1 %v500_v9  ;;  %313 = vmatpush.bf16.msra.mxu3 %v517_v42 }
  0x25   :  { %232 = vmatpush.bf16.msra.mxu2 %v508_v27 }
  0x27   :  { %151 = vmatpush.bf16.msra.mxu1 %v499_v10  ;;  %314 = vmatpush.bf16.msra.mxu3 %v516_v43 }
  0x29   :  { %233 = vmatpush.bf16.msra.mxu2 %v507_v28 }
  0x2b   :  { %152 = vmatpush.bf16.msra.mxu1 %v498_v11  ;;  %315 = vmatpush.bf16.msra.mxu3 %v515_v44 }
  0x2d   :  { %234 = vmatpush.bf16.msra.mxu2 %v506_v29 }
  0x2f   :  { %316 = vmatpush.bf16.msra.mxu3 %v514_v45 }
  0x8d   :  { %v72_v18 = vpop.f32.mrf.mxu0 }
  0x8e   :  { %v73_v20 = vadd.f32 %v72_v18, %v52_v19 }
  0x90   :  { %v77_v23 = vmax.f32 %v73_v20, 0.0 }
  0x95   :  { %v74_v21 = vpop.f32.mrf.mxu0 }
  0x96   :  { %v75_v22 = vadd.f32 %v74_v21, %v52_v19 }
  0x98   :  { %v78_v24 = vmax.f32 %v75_v22, 0.0 }
  0x9a   :  { %v79_v25 = vpack.c.bf16 %v78_v24, %v77_v23 }
  0x9c   :  { %153 = vmatmul.bf16.vlgmr.msra.gmra.mxu1 %v79_v25 }
 0x119   :  { %v154_v34 = vpop.f32.mrf.mxu1 }
 0x11a   :  { %v155_v36 = vadd.f32 %v154_v34, %v96_v35 }
 0x11c   :  { %v159_v39 = vmax.f32 %v155_v36, 0.0 }
 0x121   :  { %v156_v37 = vpop.f32.mrf.mxu1 }
 0x122   :  { %v157_v38 = vadd.f32 %v156_v37, %v96_v35 }
 0x124   :  { %v160_v40 = vmax.f32 %v157_v38, 0.0 }
 0x126   :  { %v161_v41 = vpack.c.bf16 %v160_v40, %v159_v39 }
 0x128   :  { %235 = vmatmul.bf16.vlgmr.msra.gmra.mxu2 %v161_v41 }
 0x1ab   :  { %v236_v46 = vpop.f32.mrf.mxu2 }
 0x1ac   :  { %v237_v48 = vadd.f32 %v236_v46, %v178_v47 }
 0x1ae   :  { %v241_v51 = vmax.f32 %v237_v48, 0.0 }
 0x1b3   :  { %v238_v49 = vpop.f32.mrf.mxu2 }
 0x1b4   :  { %v239_v50 = vadd.f32 %v238_v49, %v178_v47 }
 0x1b6   :  { %v242_v52 = vmax.f32 %v239_v50, 0.0 }
 0x1b8   :  { %v243_v53 = vpack.c.bf16 %v242_v52, %v241_v51 }
 0x1ba   :  { %317 = vmatmul.bf16.vlgmr.msra.gmra.mxu3 %v243_v53 }
 0x23d   :  { %v318_v57 = vpop.f32.mrf.mxu3 }
 0x23e   :  { %v319_v58 = vadd.f32 %v318_v57, %v260_v56 }
 0x240   :  { %v326_v59 = vsel %vm325_vm1, %v319_v58, -1e+30 }
 0x241   :  { %328 = vmax.xlane.f32.xlu0 %v326_v59 }
 0x245   :  { %v320_v60 = vpop.f32.mrf.mxu3 }
 0x246   :  { %v321_v61 = vadd.f32 %v320_v60, %v260_v56 }
 0x248   :  { %v327_v62 = vsel %vm325_vm1, %v321_v61, -1e+30 }
 0x249   :  { %330 = vmax.xlane.f32.xlu0 %v327_v62 }
 0x2b4   :  { %v329_v63 = vpop.xlane.xlu0 %328 }
 0x2b5   :  { %v332_v0 = vsub.f32 %v326_v59, %v329_v63 }
 0x2b7   :  { %v334_v1 = vmul.f32 1.442695, %v332_v0 }
 0x2b9   :  { %534 = vpow2.f32 %v334_v1 }
 0x2bc   :  { %v331_v2 = vpop.xlane.xlu0 %330 }
 0x2bd   :  { %v333_v3 = vsub.f32 %v327_v62, %v331_v2 }
 0x2bf   :  { %v535_v4 = vpop.eup %534  ;;  %v336_v5 = vmul.f32 1.442695, %v333_v3 }
 0x2c0   :  { %338 = vadd.xlane.f32.xlu1 %v535_v4 }
 0x2c1   :  { %536 = vpow2.f32 %v336_v5 }
 0x2c7   :  { %v537_v6 = vpop.eup %536 }
 0x2c8   :  { %340 = vadd.xlane.f32.xlu1 %v537_v6 }
 0x333   :  { %v339_v7 = vpop.xlane.xlu1 %338 }
 0x334   :  { %538 = vrcp.f32 %v339_v7  ;;  %v353_v16 = vand.u32 2147483648, %v339_v7  ;;  %vm347_vm3 = vweird.f32 %v339_v7  ;;  %v351_v17 = vand.u32 2147483647, %v339_v7 }
 0x336   :  { %v354_v23 = vor.u32 1.1754944e-38, %v353_v16  ;;  %vm352_vm6 = vcmp.eq.f32.partialorder %v351_v17, 8.507059e+37 }
 0x33a   :  { %v539_v8 = vpop.eup %538 }
 0x33b   :  { %v343_v9 = vmul.f32 %v539_v8, %v339_v7  ;;  %v341_v10 = vpop.xlane.xlu1 %340  ;;  %vm348_vm2 = vweird.f32 %v539_v8 }
 0x33c   :  { %540 = vrcp.f32 %v341_v10  ;;  %vm349_vm4 = vmor %vm347_vm3, %vm348_vm2  ;;  %v368_v19 = vand.u32 2147483648, %v341_v10  ;;  %v366_v21 = vand.u32 2147483647, %v341_v10  ;;  %vm362_vm7 = vweird.f32 %v341_v10 }
 0x33d   :  { %v344_v11 = vsub.f32 1.0, %v343_v9 }
 0x33e   :  { %v369_v25 = vor.u32 1.1754944e-38, %v368_v19  ;;  %vm367_vm9 = vcmp.eq.f32.partialorder %v366_v21, 8.507059e+37 }
 0x33f   :  { %v345_v12 = vmul.f32 %v539_v8, %v344_v11 }
 0x341   :  { %v346_v14 = vadd.f32 %v539_v8, %v345_v12 }
 0x342   :  { %v541_v13 = vpop.eup %540 }
 0x343   :  { %v358_v15 = vmul.f32 %v541_v13, %v341_v10  ;;  %vm363_vm5 = vweird.f32 %v541_v13  ;;  %v350_v22 = vsel %vm349_vm4, %v539_v8, %v346_v14 }
 0x344   :  { %vm364_vm8 = vmor %vm362_vm7, %vm363_vm5  ;;  %v355_v26 = vsel %vm352_vm6, %v354_v23, %v350_v22 }
 0x345   :  { %v359_v18 = vsub.f32 1.0, %v358_v15  ;;  %v356_v29 = vmul.f32 %v535_v4, %v355_v26 }
 0x347   :  { %v360_v20 = vmul.f32 %v541_v13, %v359_v18 }
 0x349   :  { %v361_v24 = vadd.f32 %v541_v13, %v360_v20 }
 0x34b   :  { %v365_v27 = vsel %vm364_vm8, %v541_v13, %v361_v24 }
 0x34c   :  { %v370_v28 = vsel %vm367_vm9, %v369_v25, %v365_v27 }
 0x34d   :  { %v371_v30 = vmul.f32 %v537_v6, %v370_v28 }
 0x34f   :  { %v525_v31 = vpack.c.bf16 %v371_v30, %v356_v29 }
 0x351   :  { %526 = vst [vmem:[#allocation7] sm:$0xff] %v525_v31  }
 0x352   :  { %388 = dma.vmem_to_hbm [thread:$0]  %s381_s1, 128, %s383_s25, [#allocation4], %s624_s21, %s624_s21, %s625_s22  }
 0x353   :  { %618 = dma.done.wait [#allocation4], 128  }
 0x354   :  { %619 = vsyncadd [#allocation4], 4294967168 }
 0x355   :  { %393 = vsyncpa [#allocation3], 1 }
 0x356   :  { %394 = vsyncpa [#allocation6], 1 }
 0x357   :  { %395 = vsyncpa [#allocation4], 1 }

</bundles_post_ra>
